<compile_context>
chip_gen: v7x
topology: tpu7x:2x2x1
jax: 0.10.0
libtpu: 0.0.40
codegen_flags: <defaults>
</compile_context>

<pallas_src>
import functools

import jax
import jax.numpy as jnp
from jax.experimental import pallas as pl
from jax.experimental.pallas import tpu as pltpu


def _pick_row_tile(h, w, cin, cout8, kh, kw,
                   budget_bytes=24 * 1024 * 1024,
                   target_out_bytes=4 * 1024 * 1024):
    """Output rows per grid step.

    Budgets both double-buffered operands (the per-batch flat input slab and the
    f32 output row tile) plus headroom for the in-kernel im2col intermediates,
    and keeps the output tile in the ~1-4 MiB sweet spot.  cdiv tiling: the
    wrapper zero-pads H up to nh*th, so th need not divide H.  The 24 MiB budget
    leaves headroom inside v7x's 64 MiB/TC VMEM; on v6e/v5e (128 MiB) it could be
    raised for very large images to shrink the grid further.
    """
    wp = w + (kw - 1)

    def fits(th):
        hp = -(-h // th) * th
        f = (hp + 2 * (kh - 1)) * wp
        in_bytes = 2 * cin * f * 2                    # bf16 input slab, 2 buffers
        out_bytes = 2 * cout8 * th * wp * 4           # f32 output tile, 2 buffers
        interm = 8 * (kh * kw * cin) * th * wp * 4    # im2col + acc headroom
        return in_bytes + out_bytes + interm <= budget_bytes

    th = h
    while th > 1 and (not fits(th) or cout8 * th * wp * 4 > target_out_bytes):
        th = (th + 1) // 2
    # TODO(synk): for images whose full per-batch slab cannot fit VMEM even at
    # th=1, switch the input to memory_space=pl.ANY + manual halo-window DMA.
    return th


def _make_kernel(th, nh, wp, lt, kh, kw, ph, pw):
    """Fused [3x3 conv -> bias -> tanh -> per-channel scale] on one row tile.

    Layout: channels on sublanes, flattened (row, col) padded spatial on lanes.
    A (dy, dx) tap is a contiguous lane slice of the flat padded image, so the
    kh*kw taps stack along the contraction axis into a single MXU matmul.
    """
    win = lt + (kh - 1) * wp + (kw - 1)   # input lanes needed by this row tile
    base = ph * wp - pw                   # flat offset of tap (0, 0) for local p=0

    def kernel(x_ref, w_ref, b_ref, s_ref, o_ref):
        # x_ref: (1, cin, F) bf16   full flat padded image for this batch item
        # w_ref: (cout8, kh*kw*cin) bf16
        # b_ref, s_ref: (cout8, 1) f32
        # o_ref: (1, 1, cout8, lt) f32
        if nh == 1:
            xw = x_ref[0, :, base:base + win]                 # static slice
        else:
            start = pl.program_id(1) * lt + base
            xw = x_ref[0, :, pl.ds(start, win)]               # dynamic row window
        # Slice/stack in f32 (robust relayout path); only the MXU sees bf16.
        xw = xw.astype(jnp.float32)
        taps = [xw[:, dy * wp + dx: dy * wp + dx + lt]
                for dy in range(kh) for dx in range(kw)]
        xcat = jnp.concatenate(taps, axis=0)                  # (kh*kw*cin, lt)
        acc = jnp.dot(w_ref[...], xcat.astype(jnp.bfloat16),
                      preferred_element_type=jnp.float32)     # (cout8, lt) f32
        # Epilogue in f32 (v5e has no bf16 VPU/EUP path); tanh now runs on
        # cout8 * lt elements, ~16x less EUP work than the 128-lane-padded layout.
        o_ref[0, 0] = (s_ref[...] * jnp.tanh(acc + b_ref[...])).astype(o_ref.dtype)

    return kernel


@functools.partial(jax.jit, static_argnames=("kh", "kw"))
def scaled_tanh_conv2d(x, conv_w, conv_b, scale_w, *, kh=3, kw=3):
    """Equivalent of ScaledTanh2dModule(nn.Conv2d(Cin, Cout, 3, padding=1), Cout).

    x:       (N, Cin, H, W)   NCHW float32
    conv_w:  (Cout, Cin, KH, KW)
    conv_b:  (Cout,)
    scale_w: (Cout, 1, 1)     ScaledTanh2dModule.weights
    returns: (N, Cout, H, W)  NCHW float32
    """
    assert kh % 2 == 1 and kw % 2 == 1
    n, cin, h, w = x.shape
    cout = conv_w.shape[0]
    ph, pw = kh // 2, kw // 2
    wp = w + 2 * pw                       # padded row length (lane axis unit)
    cout8 = -(-cout // 8) * 8             # Cout padded to 8 sublanes, NOT 128 lanes

    th = _pick_row_tile(h, w, cin, cout8, kh, kw)
    nh = -(-h // th)
    hp = nh * th                          # H padded so cdiv tiling needs no masks
    lt = th * wp                          # output lanes per grid step
    f = (hp + 2 * (kh - 1)) * wp          # flat padded input length per channel

    # Host-side prep: a single pad+cast pass over x (no transpose, no halo
    # duplication -- the old materialized row_tiles stack is gone).
    xf = jnp.pad(x.astype(jnp.bfloat16),
                 ((0, 0), (0, 0), (kh - 1, (kh - 1) + (hp - h)), (pw, pw)))
    xf = xf.reshape(n, cin, f)

    # Conv weights as one (Cout8, kh*kw*Cin) bf16 matrix (tap-major, ci minor) so
    # the taps fold into a single MXU matmul with K = kh*kw*Cin.
    w_cat = jnp.transpose(conv_w, (0, 2, 3, 1)).reshape(cout, kh * kw * cin)
    w_cat = jnp.pad(w_cat, ((0, cout8 - cout), (0, 0))).astype(jnp.bfloat16)
    b_col = jnp.pad(conv_b.reshape(cout, 1), ((0, cout8 - cout), (0, 0)))
    s_col = jnp.pad(scale_w.reshape(cout, 1), ((0, cout8 - cout), (0, 0)))

    kernel = _make_kernel(th, nh, wp, lt, kh, kw, ph, pw)

    in_block = cin * f * 2
    out_block = cout8 * lt * 4
    interm = 8 * (kh * kw * cin) * lt * 4
    need = 2 * (in_block + out_block) + interm + w_cat.size * 2 + 8 * cout8
    vmem_limit = min(48 * 1024 * 1024, max(4 * 1024 * 1024, 2 * need))

    cost = pl.CostEstimate(
        flops=2 * n * nh * lt * (kh * kw * cin) * cout8,
        transcendentals=n * nh * lt * cout8,
        bytes_accessed=(n * in_block + n * nh * out_block
                        + w_cat.size * 2 + 8 * cout8))

    out4 = pl.pallas_call(
        kernel,
        out_shape=jax.ShapeDtypeStruct((n, nh, cout8, lt), x.dtype),
        grid=(n, nh),
        in_specs=[
            # Full per-batch flat slab; block index is constant along the row-tile
            # axis, so Pallas DMAs it once per batch item (no halo re-reads).
            # If the halo DMA ever becomes exposed, pipeline_mode=pl.Buffered(3)
            # on this spec is the next knob.
            pl.BlockSpec((1, cin, f), lambda b, t: (b, 0, 0)),
            pl.BlockSpec((cout8, kh * kw * cin), lambda b, t: (0, 0)),
            pl.BlockSpec((cout8, 1), lambda b, t: (0, 0)),
            pl.BlockSpec((cout8, 1), lambda b, t: (0, 0)),
        ],
        out_specs=pl.BlockSpec((1, 1, cout8, lt), lambda b, t: (b, t, 0, 0)),
        compiler_params=pltpu.CompilerParams(
            dimension_semantics=("parallel", "arbitrary"),
            vmem_limit_bytes=vmem_limit),
        cost_estimate=cost,
    )(xf, w_cat, b_col, s_col)

    # (N, nh, Cout8, TH*Wp) -> (N, Cout8, Hp, Wp) -> slice channels/rows/cols.
    # The transpose only moves the nh axis (free when nh == 1); there is no
    # NHWC->NCHW pass and no 128-lane padded readback any more.
    out = jnp.transpose(out4, (0, 2, 1, 3)).reshape(n, cout8, hp, wp)
    return out[:, :cout, :h, pw:pw + w]


def _reference(x, conv_w, conv_b, scale_w):
    out = jax.lax.conv_general_dilated(
        x, conv_w, window_strides=(1, 1), padding="SAME",
        dimension_numbers=("NCHW", "OIHW", "NCHW"))
    out = out + conv_b.reshape(1, -1, 1, 1)
    return scale_w.reshape(1, -1, 1, 1) * jnp.tanh(out)


if __name__ == "__main__":
    key = jax.random.PRNGKey(0)
    k_x, k_w, k_b, k_s = jax.random.split(key, 4)

    N, Cin, H, W = 2, 4, 16, 16
    Cout, KH, KW = 4, 3, 3

    x = jax.random.normal(k_x, (N, Cin, H, W), dtype=jnp.float32)
    conv_w = 0.1 * jax.random.normal(k_w, (Cout, Cin, KH, KW), dtype=jnp.float32)
    conv_b = 0.1 * jax.random.normal(k_b, (Cout,), dtype=jnp.float32)
    # ScaledTanh2dModule.__init__ is torch.ones(C,1,1); use a trained-like value
    # so the fused per-channel scale path is actually exercised.
    scale_w = 1.0 + 0.1 * jax.random.normal(k_s, (Cout, 1, 1), dtype=jnp.float32)

    out = jax.block_until_ready(scaled_tanh_conv2d(x, conv_w, conv_b, scale_w))
    ref = jax.block_until_ready(_reference(x, conv_w, conv_b, scale_w))

    assert out.shape == (N, Cout, H, W)
    # bf16 MXU operands (f32 accumulate) -> ~1e-2 error budget vs the f32 ref.
    err = float(jnp.max(jnp.abs(out - ref)))
    assert jnp.allclose(out, ref, atol=3e-2, rtol=3e-2), f"max abs err {err}"

    print("KERNEL_OK")
</pallas_src>

<mosaic_0001>
module attributes {stable_mosaic.version = 11 : i64} {
  func.func @kernel(%arg0: i32, %arg1: i32, %arg2: memref<1x4x360xbf16, #tpu.memory_space<vmem>>, %arg3: memref<8x36xbf16, #tpu.memory_space<vmem>>, %arg4: memref<8x1xf32, #tpu.memory_space<vmem>>, %arg5: memref<8x1xf32, #tpu.memory_space<vmem>>, %arg6: memref<1x1x8x288xf32, #tpu.memory_space<vmem>>) attributes {dimension_semantics = [#tpu.dimension_semantics<parallel>, #tpu.dimension_semantics<arbitrary>], iteration_bounds = array<i64: 2, 1>, scalar_prefetch = 0 : i64, scratch_operands = 0 : i64, tpu.core_type = #tpu.core_type<tc>, window_params = [{transform_indices = @transform_0, window_bounds = array<i64: 1, 4, 360>}, {pipeline_mode = #tpu.pipeline_mode<synchronous>, transform_indices = @transform_1, window_bounds = array<i64: 8, 36>}, {pipeline_mode = #tpu.pipeline_mode<synchronous>, transform_indices = @transform_2, window_bounds = array<i64: 8, 1>}, {pipeline_mode = #tpu.pipeline_mode<synchronous>, transform_indices = @transform_3, window_bounds = array<i64: 8, 1>}, {transform_indices = @transform_4, window_bounds = array<i64: 1, 1, 8, 288>}]} {
    %c0 = arith.constant 0 : index
    %c0_0 = arith.constant 0 : index
    %c17 = arith.constant 17 : index
    %0 = vector.load %arg2[%c0, %c0_0, %c17] : memref<1x4x360xbf16, #tpu.memory_space<vmem>>, vector<1x4x326xbf16>
    %1 = vector.shape_cast %0 : vector<1x4x326xbf16> to vector<4x326xbf16>
    %2 = arith.extf %1 : vector<4x326xbf16> to vector<4x326xf32>
    %3 = vector.extract_strided_slice %2 {offsets = [0, 0], sizes = [4, 288], strides = [1, 1]} : vector<4x326xf32> to vector<4x288xf32>
    %4 = vector.extract_strided_slice %2 {offsets = [0, 1], sizes = [4, 288], strides = [1, 1]} : vector<4x326xf32> to vector<4x288xf32>
    %5 = vector.extract_strided_slice %2 {offsets = [0, 2], sizes = [4, 288], strides = [1, 1]} : vector<4x326xf32> to vector<4x288xf32>
    %6 = vector.extract_strided_slice %2 {offsets = [0, 18], sizes = [4, 288], strides = [1, 1]} : vector<4x326xf32> to vector<4x288xf32>
    %7 = vector.extract_strided_slice %2 {offsets = [0, 19], sizes = [4, 288], strides = [1, 1]} : vector<4x326xf32> to vector<4x288xf32>
    %8 = vector.extract_strided_slice %2 {offsets = [0, 20], sizes = [4, 288], strides = [1, 1]} : vector<4x326xf32> to vector<4x288xf32>
    %9 = vector.extract_strided_slice %2 {offsets = [0, 36], sizes = [4, 288], strides = [1, 1]} : vector<4x326xf32> to vector<4x288xf32>
    %10 = vector.extract_strided_slice %2 {offsets = [0, 37], sizes = [4, 288], strides = [1, 1]} : vector<4x326xf32> to vector<4x288xf32>
    %11 = vector.extract_strided_slice %2 {offsets = [0, 38], sizes = [4, 288], strides = [1, 1]} : vector<4x326xf32> to vector<4x288xf32>
    %12 = tpu.concatenate %3, %4, %5, %6, %7, %8, %9, %10, %11 in 0 : vector<4x288xf32>, vector<4x288xf32>, vector<4x288xf32>, vector<4x288xf32>, vector<4x288xf32>, vector<4x288xf32>, vector<4x288xf32>, vector<4x288xf32>, vector<4x288xf32> -> vector<36x288xf32>
    %c0_1 = arith.constant 0 : index
    %c0_2 = arith.constant 0 : index
    %13 = vector.load %arg3[%c0_1, %c0_2] : memref<8x36xbf16, #tpu.memory_space<vmem>>, vector<8x36xbf16>
    %14 = arith.truncf %12 : vector<36x288xf32> to vector<36x288xbf16>
    %cst = arith.constant dense<0.000000e+00> : vector<8x288xf32>
    %15 = tpu.matmul %13, %14, %cst {dimension_numbers = #tpu.dot_dimension_numbers<[1], [0], [0], [1], [0, 0, 1, 1], [], []>} : vector<8x36xbf16>, vector<36x288xbf16>, vector<8x288xf32> -> vector<8x288xf32>
    %c0_3 = arith.constant 0 : index
    %c0_4 = arith.constant 0 : index
    %16 = vector.load %arg5[%c0_3, %c0_4] : memref<8x1xf32, #tpu.memory_space<vmem>>, vector<8x1xf32>
    %c0_5 = arith.constant 0 : index
    %c0_6 = arith.constant 0 : index
    %17 = vector.load %arg4[%c0_5, %c0_6] : memref<8x1xf32, #tpu.memory_space<vmem>>, vector<8x1xf32>
    %18 = vector.broadcast %17 : vector<8x1xf32> to vector<8x288xf32>
    %19 = arith.addf %15, %18 : vector<8x288xf32>
    %20 = math.tanh %19 : vector<8x288xf32>
    %21 = vector.broadcast %16 : vector<8x1xf32> to vector<8x288xf32>
    %22 = arith.mulf %21, %20 : vector<8x288xf32>
    %c0_7 = arith.constant 0 : index
    %c0_8 = arith.constant 0 : index
    %c0_9 = arith.constant 0 : index
    %c0_10 = arith.constant 0 : index
    %23 = vector.load %arg6[%c0_7, %c0_8, %c0_9, %c0_10] : memref<1x1x8x288xf32, #tpu.memory_space<vmem>>, vector<1x1x8x288xf32>
    %24 = vector.shape_cast %23 : vector<1x1x8x288xf32> to vector<8x288xf32>
    %25 = vector.shape_cast %22 : vector<8x288xf32> to vector<1x1x8x288xf32>
    tpu.vector_store %arg6[%c0_7, %c0_8, %c0_9, %c0_10], %25 {strides = array<i32>} : memref<1x1x8x288xf32, #tpu.memory_space<vmem>>, vector<1x1x8x288xf32>,
    return
  }
  func.func @transform_0(%arg0: i32, %arg1: i32) -> (i32, i32, i32) {
    %c0_i32 = arith.constant 0 : i32
    %c0_i32_0 = arith.constant 0 : i32
    %c0_i32_1 = arith.constant 0 : i32
    return %arg0, %c0_i32, %c0_i32_0 : i32, i32, i32
  }
  func.func @transform_1(%arg0: i32, %arg1: i32) -> (i32, i32) {
    %c0_i32 = arith.constant 0 : i32
    %c0_i32_0 = arith.constant 0 : i32
    %c0_i32_1 = arith.constant 0 : i32
    return %c0_i32, %c0_i32_0 : i32, i32
  }
  func.func @transform_2(%arg0: i32, %arg1: i32) -> (i32, i32) {
    %c0_i32 = arith.constant 0 : i32
    %c0_i32_0 = arith.constant 0 : i32
    %c0_i32_1 = arith.constant 0 : i32
    return %c0_i32, %c0_i32_0 : i32, i32
  }
  func.func @transform_3(%arg0: i32, %arg1: i32) -> (i32, i32) {
    %c0_i32 = arith.constant 0 : i32
    %c0_i32_0 = arith.constant 0 : i32
    %c0_i32_1 = arith.constant 0 : i32
    return %c0_i32, %c0_i32_0 : i32, i32
  }
  func.func @transform_4(%arg0: i32, %arg1: i32) -> (i32, i32, i32, i32) {
    %c0_i32 = arith.constant 0 : i32
    %c0_i32_0 = arith.constant 0 : i32
    %c0_i32_1 = arith.constant 0 : i32
    return %arg0, %arg1, %c0_i32, %c0_i32_0 : i32, i32, i32, i32
  }
}

</mosaic_0001>

<bundles_post_ra>
// kernel: scaled_tanh_conv2d.1
= control target key start
LH: loop header
LB: loop body
LE: loop exit
PB: predicated region body
PF: predicated region fallthrough
CT: control target
= control target key end

     0   :  { %s762_s15 = smov 0   ;;  %s764_s16 = smov 0   ;;  %s872_s0 = inlined_call_operand.vmem [shape: bf16[2,4,360], index: 0, kind: input, shape index: {}]   ;;  %s873_s1 = inlined_call_operand.vmem [shape: bf16[8,36], index: 1, kind: input, shape index: {}]   ;;  %s874_s2 = inlined_call_operand.vmem [shape: f32[8,1], index: 2, kind: input, shape index: {}]   ;;  %s875_s3 = inlined_call_operand.vmem [shape: f32[8,1], index: 3, kind: input, shape index: {}]   ;;  %s876_s4 = inlined_call_operand.vmem [shape: f32[2,1,8,288], index: 4, kind: output, shape index: {}]  }
   0x1   :  { %s766_s17 = smov 0  }
   0x2 LB: > { %s26_s18 = sadd.s32 1, %s719_s16  ;;  %p593_p0 = scmp.ge.s32.totalorder %s723_s17, 1  ;;  %s723_s17 = sphi %s766_s17, %s14_s17   ;;  %s719_s16 = sphi %s764_s16, %s878_s16   ;;  %s715_s15 = sphi %s762_s15, %s877_s15  }
   0x3   : > { %p28_p1 = scmp.ge.s32.totalorder %s26_s18, 2  ;;  %p176_p2 = scmp.lt.s32.totalorder %s723_s17, 3 }
   0x5   : > { %s880_s18 = smov (%p28_p1, %s26_s18), 0  ;;  %p177_p3 = pnand %p593_p0, %p176_p2 }
   0x6   : > { %p206_p4 = scmp.lt.s32.totalorder (!%p177_p3), %s715_s15, 1  ;;  %s725_s23 = smov (!%p177_p3), 126   ;;  %v733_v9 = vmov (!%p177_p3), 0.0   ;;  %vm326_vm0 = vcmask (!%p177_p3), 1043456   ;;  %vm272_vm1 = vcmask (!%p177_p3), 891904   ;;  %vm284_vm2 = vcmask (!%p177_p3), 883712  }
   0x7   : > { %180 = sbr.rel (%p177_p3) target bundleno = 526 (0x20e), region = 36  ;;  %s726_s24 = smov (!%p177_p3), 110   ;;  %605 = vmatprep.subr.bf16.mxu1 (!%p177_p3), %v733_v9  ;;  %vm296_vm3 = vcmask (!%p177_p3), 752640   ;;  %vm236_vm4 = vcmask (!%p177_p3), 1039360   ;;  %vm248_vm5 = vcmask (!%p177_p3), 1031168   ;;  %vm260_vm6 = vcmask (!%p177_p3), 900096  }
   0x8   : > { %s727_s25 = smov (!%p177_p3), 127   ;;  %s728_s26 = smov (!%p177_p3), 109   ;;  %vm308_vm7 = vcmask (!%p177_p3), 744448   ;;  %vm320_vm8 = vcmask (!%p177_p3), 736256   ;;  %vm735_vm9 = vmmov (!%p177_p3), 0   ;;  %vm383_vm10 = vcmask (!%p177_p3), 908288  }
   0x9   : > { %s729_s27 = smov (!%p177_p3), 108   ;;  %s730_s28 = smov (!%p177_p3), 92   ;;  %611 = vmatprep.mubr.msk.bf16.mxu1 (!%p177_p3), %vm735_vm9, %v733_v9  ;;  %vm400_vm11 = vcmask (!%p177_p3), 1041408   ;;  %vm396_vm12 = vcmask (!%p177_p3), 293888   ;;  %vm504_vm13 = vcmask (!%p177_p3), 261120  }
   0xa   : > { %s731_s29 = smov (!%p177_p3), 91   ;;  %s732_s30 = smov (!%p177_p3), 90  }
   0xb   : > { %s734_s5 = smov (!%p177_p3), 111  }
   0xe   : > { %s882_s15 = smov (!%p206_p4, %s715_s15), 1 }
   0xf   : > { %s615_s19 = smul.u32 6, %s882_s15 }
  0x10   : > { %s616_s12 = smul.u32 24, %s882_s15 }
  0x11   : > { %s210_s22 = scalar_lea.vmem %s872_s0, %s615_s19 }
  0x12   : > { %v221_v0 = vld [vmem:[%s210_s22] sm:$0x3f]  ;;  %s219_s19 = scalar_lea.vmem %s876_s4, %s616_s12 }
  0x13   : > { %v786_v1 = vunpack.c.l.bf16 %v221_v0  ;;  %v223_v2 = vunpack.c.h.bf16 %v221_v0 }
  0x15   : > { %242 = vrot.lane.b32.xlu0 %v786_v1, %s725_s23  ;;  %v229_v3 = vcombine.low %v223_v2, %v223_v2  ;;  %v791_v4 = vcombine.high %v786_v1, %v786_v1  ;;  %v228_v6 = vcombine.low %v786_v1, %v786_v1 }
  0x17   : > { %v663_v5 = vpack.i.bf16 %v229_v3, %v786_v1  ;;  %v658_v7 = vpack.i.bf16 %v223_v2, %v791_v4  ;;  %v688_v8 = vpack.i.bf16 %v791_v4, %v786_v1 }
  0x19   : > { %664 = vrot.lane.b32.xlu1 %v663_v5, %s726_s24  ;;  %654 = vrot.lane.b32.xlu0 %v663_v5, %s727_s25 }
  0x1d   : > { %230 = vrot.lane.b32.xlu1 %v228_v6, %s727_s25  ;;  %659 = vrot.lane.b32.xlu0 %v658_v7, %s725_s23 }
  0x21   : > { %254 = vrot.lane.b32.xlu1 %v228_v6, %s726_s24  ;;  %669 = vrot.lane.b32.xlu0 %v658_v7, %s728_s26 }
  0x25   : > { %674 = vrot.lane.b32.xlu1 %v663_v5, %s729_s27  ;;  %679 = vrot.lane.b32.xlu0 %v658_v7, %s730_s28 }
  0x29   : > { %684 = vrot.lane.b32.xlu1 %v663_v5, %s731_s29  ;;  %266 = vrot.lane.b32.xlu0 %v786_v1, %s728_s26 }
  0x2d   : > { %278 = vrot.lane.b32.xlu1 %v228_v6, %s729_s27  ;;  %290 = vrot.lane.b32.xlu0 %v786_v1, %s730_s28 }
  0x31   : > { %302 = vrot.lane.b32.xlu1 %v228_v6, %s731_s29  ;;  %689 = vrot.lane.b32.xlu0 %v688_v8, %s732_s30 }
  0x35   : > { %318 = vrot.lane.b32.xlu1 %v223_v2, %s732_s30 }
  0x87   : > { %v243_v10 = vpop.permute.xlu0 %242 }
  0x8b   : > { %v665_v11 = vpop.permute.xlu1 %664  ;;  %v655_v12 = vpop.permute.xlu0 %654 }
  0x8c   : > { %v657_v13 = vunpack.i.h.bf16 %v655_v12  ;;  %v667_v16 = vunpack.i.h.bf16 %v665_v11  ;;  %v666_v32 = vunpack.i.l.bf16 %v665_v11  ;;  %v656_v33 = vunpack.i.l.bf16 %v655_v12 }
  0x8e   : > { %v329_v18 = vsel %vm326_vm0, %v223_v2, %v657_v13  ;;  %v238_v41 = vsel %vm236_vm4, %v656_v33, %v657_v13  ;;  %v262_v46 = vsel %vm260_vm6, %v666_v32, %v667_v16  ;;  %v736_v13 = vmov 0  }
  0x8f   : > { %v231_v14 = vpop.permute.xlu1 %230  ;;  %v660_v15 = vpop.permute.xlu0 %659  ;;  %v328_v54 = vsel %vm326_vm0, %v791_v4, %v238_v41  ;;  %442 = vmatprep.mubr.bf16.mxu0 %v736_v13  ;;  %694 = vset.pattern.permute.xlu0 %v736_v13 }
  0x90   : > { %v662_v17 = vunpack.i.h.bf16 %v660_v15  ;;  %v661_v31 = vunpack.i.l.bf16 %v660_v15  ;;  %v237_v56 = vsel %vm236_vm4, %v231_v14, %v656_v33  ;;  %693 = vset.pattern.permute.xlu1 %v736_v13 }
  0x91   : > { %v327_v5 = vsel %vm326_vm0, %v786_v1, %v237_v56 }
  0x92   : > { %v332_v19 = vsel %vm326_vm0, %v662_v17, %v667_v16  ;;  %v250_v42 = vsel %vm248_vm5, %v661_v31, %v662_v17  ;;  %v249_v57 = vsel %vm248_vm5, %v243_v10, %v661_v31  ;;  %v350_v17 = vld [vmem:[%s874_s2] sm:$0xff] }
  0x93   : > { %v255_v20 = vpop.permute.xlu1 %254  ;;  %v670_v21 = vpop.permute.xlu0 %669  ;;  %v342_v22 = vpack.c.bf16 %v332_v19, %v329_v18  ;;  %v331_v55 = vsel %vm326_vm0, %v250_v42, %v262_v46  ;;  %v349_v18 = vld [vmem:[%s875_s3] sm:$0xff] }
  0x94   : > { %v672_v23 = vunpack.i.h.bf16 %v670_v21  ;;  %v671_v24 = vunpack.i.l.bf16 %v670_v21  ;;  %v261_v52 = vsel %vm260_vm6, %v255_v20, %v666_v32  ;;  %v341_v62 = vpack.c.bf16 %v331_v55, %v328_v54 }
  0x95   : > { %369 = vrot.lane.b32.xlu1 %v342_v22, %s734_s5  ;;  %v330_v59 = vsel %vm326_vm0, %v249_v57, %v261_v52 }
  0x96   : > { %v274_v36 = vsel %vm272_vm1, %v671_v24, %v672_v23  ;;  %v340_v12 = vpack.c.bf16 %v330_v59, %v327_v5 }
  0x97   : > { %v675_v25 = vpop.permute.xlu1 %674  ;;  %v680_v26 = vpop.permute.xlu0 %679 }
  0x98   : > { %v677_v27 = vunpack.i.h.bf16 %v675_v25  ;;  %v676_v28 = vunpack.i.l.bf16 %v675_v25  ;;  %v682_v29 = vunpack.i.h.bf16 %v680_v26  ;;  %v681_v30 = vunpack.i.l.bf16 %v680_v26 }
  0x9a   : > { %v286_v39 = vsel %vm284_vm2, %v676_v28, %v677_v27  ;;  %v298_v40 = vsel %vm296_vm3, %v681_v30, %v682_v29  ;;  %v335_v44 = vsel %vm326_vm0, %v672_v23, %v677_v27 }
  0x9b   : > { %v685_v34 = vpop.permute.xlu1 %684  ;;  %v267_v35 = vpop.permute.xlu0 %266  ;;  %v334_v50 = vsel %vm326_vm0, %v274_v36, %v286_v39 }
  0x9c   : > { %v687_v37 = vunpack.i.h.bf16 %v685_v34  ;;  %v686_v38 = vunpack.i.l.bf16 %v685_v34  ;;  %v273_v60 = vsel %vm272_vm1, %v267_v35, %v671_v24  ;;  %v339_v35 = vld [vmem:[%s873_s1] sm:$0xf] }
  0x9e   : > { %v310_v43 = vsel %vm308_vm7, %v686_v38, %v687_v37  ;;  %v338_v45 = vsel %vm326_vm0, %v682_v29, %v687_v37 }
  0x9f   : > { %v279_v47 = vpop.permute.xlu1 %278  ;;  %v291_v48 = vpop.permute.xlu0 %290  ;;  %v345_v49 = vpack.c.bf16 %v338_v45, %v335_v44  ;;  %v337_v51 = vsel %vm326_vm0, %v298_v40, %v310_v43 }
  0xa0   : > { %v344_v53 = vpack.c.bf16 %v337_v51, %v334_v50  ;;  %v285_v58 = vsel %vm284_vm2, %v279_v47, %v676_v28  ;;  %v297_v0 = vsel %vm296_vm3, %v291_v48, %v681_v30 }
  0xa1   : > { %375 = vrot.lane.b32.xlu0 %v345_v49, %s734_s5  ;;  %v333_v6 = vsel %vm326_vm0, %v273_v60, %v285_v58 }
  0xa2   : > { %373 = vrot.lane.b32.xlu1 %v344_v53, %s734_s5 }
  0xa3   : > { %v303_v61 = vpop.permute.xlu1 %302  ;;  %v690_v63 = vpop.permute.xlu0 %689 }
  0xa4   : > { %v309_v2 = vsel %vm308_vm7, %v303_v61, %v686_v38  ;;  %v692_v3 = vunpack.i.h.bf16 %v690_v63  ;;  %v691_v4 = vunpack.i.l.bf16 %v690_v63 }
  0xa5   : > { %v336_v7 = vsel %vm326_vm0, %v297_v0, %v309_v2  ;;  %367 = vrot.lane.b32.xlu0 %v341_v62, %s734_s5 }
  0xa6   : > { %v343_v8 = vpack.c.bf16 %v336_v7, %v333_v6  ;;  %v321_v10 = vsel %vm320_vm8, %v691_v4, %v692_v3 }
  0xa7   : > { %v319_v11 = vpop.permute.xlu1 %318  ;;  %v346_v15 = vpack.c.bf16 %v321_v10, %v321_v10 }
  0xa8   : > { %371 = vrot.lane.b32.xlu1 %v343_v8, %s734_s5  ;;  %v322_v1 = vsel %vm320_vm8, %v692_v3, %v319_v11  ;;  %v348_v16 = vpack.c.bf16 %v319_v11, %v319_v11 }
  0xa9   : > { %v347_v14 = vpack.c.bf16 %v322_v1, %v322_v1  ;;  %365 = vrot.lane.b32.xlu0 %v340_v12, %s734_s5 }
  0xac   : > { %379 = vrot.lane.b32.xlu1 %v347_v14, %s734_s5 }
  0xad   : > { %377 = vrot.lane.b32.xlu0 %v346_v15, %s734_s5 }
  0xb0   : > { %353 = vperm.xlu1 %693, %v350_v17  }
  0xb1   : > { %381 = vrot.lane.b32.xlu0 %v348_v16, %s734_s5 }
  0xb5   : > { %496 = vperm.xlu0 %694, %v349_v18  }
 0x107   : > { %v370_v19 = vpop.permute.xlu1 %369 }
 0x108   : > { %606 = vmatpush3.bf16.msra.mxu1 %v370_v19 }
 0x109   : > { %607 = vmatprep.subr.bf16.mxu1 %v733_v9 }
 0x113   : > { %v376_v20 = vpop.permute.xlu0 %375 }
 0x114   : > { %608 = vmatpush3.bf16.msra.mxu1 %v376_v20  ;;  %v374_v21 = vpop.permute.xlu1 %373 }
 0x115   : > { %609 = vmatprep.subr.bf16.mxu1 %v733_v9  ;;  %v387_v27 = vsel %vm383_vm10, %v374_v21, %v376_v20 }
 0x117   : > { %v368_v22 = vpop.permute.xlu0 %367 }
 0x118   : > { %v385_v23 = vsel %vm383_vm10, %v368_v22, %v370_v19 }
 0x119   : > { %410 = vmatprep.subr.bf16.mxu0 %v385_v23 }
 0x11a   : > { %v372_v24 = vpop.permute.xlu1 %371 }
 0x11b   : > { %v366_v25 = vpop.permute.xlu0 %365  ;;  %v386_v30 = vsel %vm383_vm10, %v372_v24, %v374_v21 }
 0x11c   : > { %v384_v26 = vsel %vm383_vm10, %v366_v25, %v368_v22 }
 0x11d   : > { %411 = vmatpush1.bf16.msra.mxu0 %v384_v26 }
 0x11e   : > { %412 = vmatprep.subr.bf16.mxu0 %v387_v27  ;;  %v380_v28 = vpop.permute.xlu1 %379 }
 0x11f   : > { %v378_v29 = vpop.permute.xlu0 %377 }
 0x120   : > { %v388_v9 = vsel %vm383_vm10, %v378_v29, %v380_v28 }
 0x121   : > { %413 = vmatpush1.bf16.msra.mxu0 %v386_v30  ;;  %v402_v34 = vsel %vm400_vm11, %v388_v9, 0 }
 0x123   : > { %v382_v31 = vpop.permute.xlu0 %381 }
 0x124   : > { %v389_v32 = vsel %vm383_vm10, %v380_v28, %v382_v31  ;;  %v408_v33 = vsel %vm400_vm11, %v382_v31, 0 }
 0x125   : > { %596 = vmatprep.subr.msk.bf16.mxu0 %vm400_vm11, %v389_v32  ;;  %610 = vmatpush3.bf16.msra.mxu1 %v408_v33 }
 0x126   : > { %415 = vmatpush1.bf16.msra.mxu0 %v402_v34 }
 0x128   : > { %612 = vmatmul.mubr.msk.bf16.vlgmr.msra.gmra.mrb[0].mxu1 %vm396_vm12, %v339_v35 }
 0x129   : > { %597 = vmatmul.mubr.msk.bf16.vlgmr.msra.gmra.mrb[0].mxu0 %vm396_vm12, %v339_v35 }
 0x12f   : > { %v354_v36 = vpop.permute.xlu1 %353 }
 0x134   : > { %v497_v48 = vpop.permute.xlu0 %496 }
 0x1fb   : > { %v485_v37 = vpop.f32.mrb[0].mxu1 }
 0x1fc   : > { %v486_v38 = vadd.f32 %v485_v37, %v354_v36  ;;  %v444_v39 = vpop.f32.mrb[0].mxu0  ;;  %v613_v40 = vpop.f32.mrb[1].mxu1 }
 0x1fd   : > { %v445_v41 = vadd.f32 %v444_v39, %v354_v36  ;;  %v446_v42 = vpop.f32.mrb[1].mxu0  ;;  %v488_v43 = vpop.f32.mrb[2].mxu1 }
 0x1fe   : > { %695 = vtanh.f32 %v486_v38  ;;  %v447_v44 = vadd.f32 %v446_v42, %v354_v36  ;;  %v448_v45 = vpop.f32.mrb[2].mxu0  ;;  %v614_v46 = vpop.f32.mrb[3].mxu1 }
 0x1ff   : > { %697 = vtanh.f32 %v445_v41  ;;  %v449_v47 = vpop.f32.mrb[3].mxu0 }
 0x200   : > { %699 = vtanh.f32 %v447_v44 }
 0x208   : > { %v696_v49 = vpop.eup %695 }
 0x209   : > { %v698_v50 = vpop.eup %697  ;;  %v501_v51 = vmul.f32 %v696_v49, %v497_v48 }
 0x20a   : > { %v700_v52 = vpop.eup %699  ;;  %v499_v53 = vmul.f32 %v698_v50, %v497_v48 }
 0x20b   : > { %v500_v54 = vmul.f32 %v700_v52, %v497_v48  ;;  %505 = vst.msk [vmem:[%s219_s19 + $0x10] sm:$0xff] %vm504_vm13, %v501_v51 }
 0x20c   : > { %502 = vst [vmem:[%s219_s19] sm:$0xff] %v499_v53 }
 0x20d   : > { %503 = vst [vmem:[%s219_s19 + $0x8] sm:$0xff] %v500_v54 }
 0x20e PF: > { %s14_s17 = sadd.s32 1, %s723_s17   ;;  %s877_s15 = smov %s719_s16 }
 0x20f   : > { %p11_p5 = scmp.ge.s32.totalorder %s14_s17, 4   ;;  %s878_s16 = smov %s880_s18 }
 0x211   :  { %13 = sbr.rel (!%p11_p5) target bundleno = 2 (0x2), region = 66 }

</bundles_post_ra>
